<compile_context>
chip_gen: v7x
topology: tpu7x:2x2x1
jax: 0.10.0
libtpu: 0.0.40
codegen_flags: <defaults>
</compile_context>

<pallas_src>
import functools

import jax
import jax.numpy as jnp
from jax.experimental import pallas as pl
from jax.experimental.pallas import tpu as pltpu

LANE = 128                       # TPU lane width (last dim of every block)
SUBLANES = 8                     # f32 sublanes per vreg
INNER_BYTES = 256 * 1024         # per-chunk bytes processed inside a block
DEFAULT_TILE_BYTES = 4 * 1024 * 1024   # per-input per-step DMA (v6e / v7x)
V5E_TILE_BYTES = 2 * 1024 * 1024       # 1-2 MiB steps are already ~roofline on v5e


def _device_kind():
    try:
        return jax.devices()[0].device_kind.lower()
    except Exception:
        return ""


def _round_down(a, b):
    return (a // b) * b


def _sse_kernel(x_ref, y_ref, o_ref, *, n_blocks, tile_rows, chunk_rows,
                n_chunks, valid_rows, need_mask):
    """Accumulate lane/sublane-wise partial sums of (x - y)^2 into o_ref.

    o_ref is a resident (1, 8, 128) f32 block (same block for every step of
    the inner reduction axis); the single cross-lane reduce + log10 happen in
    the wrapper.
    """
    c = pl.program_id(0)          # slice axis (one per TensorCore on v7x)
    i = pl.program_id(1)          # reduction axis (resident output block)

    @pl.when(i == 0)
    def _init():
        o_ref[...] = jnp.zeros_like(o_ref)

    # Logical (unclamped) first row covered by this block.  Blocks whose
    # logical range lies entirely past `valid_rows` were clamped by the
    # index_map to re-read the last real block and are fully masked here.
    block_row0 = (c * n_blocks + i) * tile_rows

    if need_mask:
        # Hoisted out of the chunk loop (JAX does not CSE broadcasts).
        local_row = jax.lax.broadcasted_iota(jnp.int32, (chunk_rows, LANE), 0)

    def chunk_sum(k, acc):
        r0 = pl.multiple_of(k * chunk_rows, chunk_rows)
        xv = x_ref[pl.ds(r0, chunk_rows), :].astype(jnp.float32)
        yv = y_ref[pl.ds(r0, chunk_rows), :].astype(jnp.float32)
        d = xv - yv
        sq = d * d
        if need_mask:
            # Rows at/after `valid_rows` hold Pallas-padded garbage (possibly
            # NaN/Inf): the where() discards them.  Do NOT reorder the mask
            # after the reduction.
            limit = valid_rows - block_row0 - k * chunk_rows
            sq = jnp.where(local_row < limit, sq, jnp.float32(0.0))
        # Pure VPU adds: fold the chunk down to one (8, 128) vreg of sums.
        return acc + sq.reshape(-1, SUBLANES, LANE).sum(axis=0)

    zero = jnp.zeros((SUBLANES, LANE), jnp.float32)
    if n_chunks == 1:
        acc = chunk_sum(0, zero)
    else:
        acc = jax.lax.fori_loop(0, n_chunks, chunk_sum, zero)
    o_ref[...] += acc            # (8,128) broadcasts into the (1,8,128) block


def psnr_metric(x, y, data_range=1.0):
    """Pallas PSNR over all elements of x / y (any shape); returns scalar f32."""
    assert x.shape == y.shape, "input/target shapes must match"
    total_n = int(x.size)

    xf = jnp.ravel(x)
    yf = jnp.ravel(y)

    x_item = jnp.dtype(x.dtype).itemsize
    y_item = jnp.dtype(y.dtype).itemsize
    itemsize = max(x_item, y_item)
    sub = max(SUBLANES, 32 // min(x_item, y_item))   # 8 f32 / 16 bf16 / 32 int8

    kind = _device_kind()
    is_v7 = ("v7" in kind) or ("7x" in kind)
    is_v5e = ("v5" in kind and "lite" in kind) or ("v5e" in kind)
    tile_bytes = V5E_TILE_BYTES if is_v5e else DEFAULT_TILE_BYTES

    rows = total_n // LANE
    main_n = rows * LANE if rows >= sub else 0

    sse = jnp.float32(0.0)

    if main_n > 0:
        # Zero-copy bitcast when total_n is 128-aligned (the common case).
        # Otherwise the prefix slice may materialize a copy before the kernel;
        # the leftover sub-128-element lane tail itself is tiny.
        xm = xf if main_n == total_n else xf[:main_n]
        ym = yf if main_n == total_n else yf[:main_n]
        x2 = xm.reshape(rows, LANE)
        y2 = ym.reshape(rows, LANE)

        # Dtype-aware byte budgets -> rows per chunk / rows per block.
        inner_rows = max(sub, _round_down(INNER_BYTES // (LANE * itemsize), sub))
        budget_rows = max(inner_rows, tile_bytes // (LANE * itemsize))
        if rows >= inner_rows:
            chunk_rows = inner_rows
            tile_rows = chunk_rows * min(budget_rows // chunk_rows,
                                         rows // chunk_rows)
        else:
            chunk_rows = _round_down(rows, sub)      # >= sub here
            tile_rows = chunk_rows
        n_chunks = tile_rows // chunk_rows

        total_blocks = pl.cdiv(rows, tile_rows)
        p = 2 if total_blocks >= 2 else 1            # slice split (v7x: 1/TC)
        n_blocks = pl.cdiv(total_blocks, p)
        # True iff some block's logical row range extends past `rows`.
        need_mask = (p * n_blocks * tile_rows) != rows
        last_block = total_blocks - 1

        if p * n_blocks > total_blocks:
            # Clamp logical block indices falling past the array (those blocks
            # are fully masked in the kernel) so no DMA ever reads OOB HBM.
            def in_map(c, i):
                return (jnp.minimum(c * n_blocks + i, last_block), 0)
        else:
            def in_map(c, i):
                return (c * n_blocks + i, 0)

        kernel = functools.partial(
            _sse_kernel, n_blocks=n_blocks, tile_rows=tile_rows,
            chunk_rows=chunk_rows, n_chunks=n_chunks,
            valid_rows=rows, need_mask=need_mask)

        axis0 = pltpu.CORE_PARALLEL if (is_v7 and p > 1) else pltpu.PARALLEL

        partials = pl.pallas_call(
            kernel,
            out_shape=jax.ShapeDtypeStruct((p, SUBLANES, LANE), jnp.float32),
            grid_spec=pltpu.PrefetchScalarGridSpec(
                num_scalar_prefetch=0,
                grid=(p, n_blocks),
                in_specs=[
                    pl.BlockSpec((tile_rows, LANE), in_map),
                    pl.BlockSpec((tile_rows, LANE), in_map),
                ],
                # Same output block across the inner axis -> resident acc.
                out_specs=pl.BlockSpec((1, SUBLANES, LANE),
                                       lambda c, i: (c, 0, 0)),
            ),
            compiler_params=pltpu.CompilerParams(
                dimension_semantics=(axis0, pltpu.ARBITRARY),
                vmem_limit_bytes=32 * 1024 * 1024),
            cost_estimate=pl.CostEstimate(
                flops=3 * main_n,
                transcendentals=0,
                bytes_accessed=main_n * (x_item + y_item)
                               + p * SUBLANES * LANE * 4),
        )(x2, y2)
        # Tiny (p,8,128) reduce; fused by XLA with the log10 finalization below.
        sse = jnp.sum(partials)

    if total_n > main_n:
        # Sub-128-element lane tail (or very small inputs) in plain JAX.
        dt = xf[main_n:].astype(jnp.float32) - yf[main_n:].astype(jnp.float32)
        sse = sse + jnp.sum(dt * dt)

    # float32(total_n) is exact up to 2**24 elements; beyond that the ~6e-8
    # relative rounding is negligible for PSNR.
    mse = sse / jnp.float32(total_n)
    dr = jnp.float32(data_range)
    return jnp.float32(10.0) * jnp.log10(dr * dr / mse)


class PsnrMetric:
    """JAX/Pallas port of the PyTorch PsnrMetric module."""

    def __init__(self, *psnr_args, **psnr_kwargs):
        self.psnr_args = psnr_args
        self.psnr_kwargs = psnr_kwargs

    def __call__(self, input, target):
        return psnr_metric(input, target, *self.psnr_args, **self.psnr_kwargs)


if __name__ == "__main__":
    key = jax.random.PRNGKey(0)
    k1, k2, k3, k4 = jax.random.split(key, 4)

    metric = PsnrMetric(data_range=1.0)

    def ref_psnr(a, b, dr=1.0):
        mse = jnp.mean((a.astype(jnp.float32) - b.astype(jnp.float32)) ** 2)
        return 10.0 * jnp.log10(dr * dr / mse)

    # Test 1: lane-aligned NCHW batch (zero-copy bitcast path).
    x1 = jax.random.uniform(k1, (2, 4, 16, 16), dtype=jnp.float32)
    y1 = jnp.clip(x1 + 0.05 * jax.random.normal(k2, x1.shape, dtype=jnp.float32),
                  0.0, 1.0)
    p1 = metric(x1, y1)

    # Test 2: ragged shape (exercises in-kernel row masking + lane tail).
    x2 = jax.random.uniform(k3, (2, 3, 17, 19), dtype=jnp.float32)
    y2 = jnp.clip(x2 + 0.05 * jax.random.normal(k4, x2.shape, dtype=jnp.float32),
                  0.0, 1.0)
    p2 = metric(x2, y2)

    jax.block_until_ready((p1, p2))

    r1, r2 = ref_psnr(x1, y1), ref_psnr(x2, y2)
    assert jnp.allclose(p1, r1, rtol=1e-4, atol=1e-4), (p1, r1)
    assert jnp.allclose(p2, r2, rtol=1e-4, atol=1e-4), (p2, r2)

    print("KERNEL_OK")
</pallas_src>

<mosaic_0001>
module attributes {stable_mosaic.version = 11 : i64} {
  func.func @_sse_kernel(%arg0: i32, %arg1: i32, %arg2: memref<16x128xf32, #tpu.memory_space<vmem>>, %arg3: memref<16x128xf32, #tpu.memory_space<vmem>>, %arg4: memref<1x8x128xf32, #tpu.memory_space<vmem>>) attributes {dimension_semantics = [#tpu.dimension_semantics<parallel>, #tpu.dimension_semantics<arbitrary>], iteration_bounds = array<i64: 1, 1>, scalar_prefetch = 0 : i64, scratch_operands = 0 : i64, tpu.core_type = #tpu.core_type<tc>, window_params = [{transform_indices = @transform_0, window_bounds = array<i64: 16, 128>}, {transform_indices = @transform_1, window_bounds = array<i64: 16, 128>}, {transform_indices = @transform_2, window_bounds = array<i64: 1, 8, 128>}]} {
    %c0_i32 = arith.constant 0 : i32
    %0 = arith.cmpi eq, %arg1, %c0_i32 : i32
    %1 = arith.extui %0 : i1 to i32
    %c0_i32_0 = arith.constant 0 : i32
    %2 = arith.cmpi ne, %1, %c0_i32_0 : i32
    scf.if %2 {
      %cst_10 = arith.constant 0.000000e+00 : f32
      %18 = vector.broadcast %cst_10 : f32 to vector<1x8x128xf32>
      %c0_11 = arith.constant 0 : index
      %c0_12 = arith.constant 0 : index
      %c0_13 = arith.constant 0 : index
      %19 = vector.load %arg4[%c0_11, %c0_12, %c0_13] : memref<1x8x128xf32, #tpu.memory_space<vmem>>, vector<1x8x128xf32>
      tpu.vector_store %arg4[%c0_11, %c0_12, %c0_13], %18 {strides = array<i32>} : memref<1x8x128xf32, #tpu.memory_space<vmem>>, vector<1x8x128xf32>,
    } else {
    }
    %cst = arith.constant 0.000000e+00 : f32
    %3 = vector.broadcast %cst : f32 to vector<8x128xf32>
    %c0_i32_1 = arith.constant 0 : i32
    %4 = tpu.assume_multiple %c0_i32_1, 16 : i32
    %5 = arith.index_cast %4 : i32 to index
    %c0 = arith.constant 0 : index
    %6 = vector.load %arg2[%5, %c0] : memref<16x128xf32, #tpu.memory_space<vmem>>, vector<16x128xf32>
    %7 = arith.index_cast %4 : i32 to index
    %c0_2 = arith.constant 0 : index
    %8 = vector.load %arg3[%7, %c0_2] : memref<16x128xf32, #tpu.memory_space<vmem>>, vector<16x128xf32>
    %9 = arith.subf %6, %8 : vector<16x128xf32>
    %10 = arith.mulf %9, %9 : vector<16x128xf32>
    %11 = vector.shape_cast %10 : vector<16x128xf32> to vector<2x8x128xf32>
    %cst_3 = arith.constant dense<0.000000e+00> : vector<8x128xf32>
    %12 = vector.multi_reduction <add>, %11, %cst_3 [0] : vector<2x8x128xf32> to vector<8x128xf32>
    %13 = arith.addf %3, %12 : vector<8x128xf32>
    %c0_4 = arith.constant 0 : index
    %c0_5 = arith.constant 0 : index
    %c0_6 = arith.constant 0 : index
    %14 = vector.load %arg4[%c0_4, %c0_5, %c0_6] : memref<1x8x128xf32, #tpu.memory_space<vmem>>, vector<1x8x128xf32>
    %15 = vector.shape_cast %13 : vector<8x128xf32> to vector<1x8x128xf32>
    %16 = arith.addf %14, %15 : vector<1x8x128xf32>
    %c0_7 = arith.constant 0 : index
    %c0_8 = arith.constant 0 : index
    %c0_9 = arith.constant 0 : index
    %17 = vector.load %arg4[%c0_7, %c0_8, %c0_9] : memref<1x8x128xf32, #tpu.memory_space<vmem>>, vector<1x8x128xf32>
    tpu.vector_store %arg4[%c0_7, %c0_8, %c0_9], %16 {strides = array<i32>} : memref<1x8x128xf32, #tpu.memory_space<vmem>>, vector<1x8x128xf32>,
    return
  }
  func.func @transform_0(%arg0: i32, %arg1: i32) -> (i32, i32) {
    %c1_i32 = arith.constant 1 : i32
    %0 = arith.muli %arg0, %c1_i32 : i32
    %1 = arith.addi %0, %arg1 : i32
    %c0_i32 = arith.constant 0 : i32
    %c0_i32_0 = arith.constant 0 : i32
    return %1, %c0_i32 : i32, i32
  }
  func.func @transform_1(%arg0: i32, %arg1: i32) -> (i32, i32) {
    %c1_i32 = arith.constant 1 : i32
    %0 = arith.muli %arg0, %c1_i32 : i32
    %1 = arith.addi %0, %arg1 : i32
    %c0_i32 = arith.constant 0 : i32
    %c0_i32_0 = arith.constant 0 : i32
    return %1, %c0_i32 : i32, i32
  }
  func.func @transform_2(%arg0: i32, %arg1: i32) -> (i32, i32, i32) {
    %c0_i32 = arith.constant 0 : i32
    %c0_i32_0 = arith.constant 0 : i32
    %c0_i32_1 = arith.constant 0 : i32
    return %arg0, %c0_i32, %c0_i32_0 : i32, i32, i32
  }
}

</mosaic_0001>

<bundles_post_ra>
// kernel: tpu_custom_call.1
= control target key start
LH: loop header
LB: loop body
LE: loop exit
PB: predicated region body
PF: predicated region fallthrough
CT: control target
= control target key end

     0   :  { %7 = vsyncpa [#allocation3], 0  ;;  %s220_s0 = inlined_call_operand.hbm [shape: f32[16,128], index: 0, kind: input, shape index: {}]   ;;  %s221_s1 = inlined_call_operand.hbm [shape: f32[16,128], index: 1, kind: input, shape index: {}]   ;;  %s222_s2 = inlined_call_operand.hbm [shape: f32[1,8,128], index: 2, kind: output, shape index: {}]  }
   0x1   :  { %8 = vsyncpa [#allocation6], 0 }
   0x2   :  { %9 = vsyncpa [#allocation4], 0  ;;  %s164_s9 = smov [#allocation2]   ;;  %s92_s13 = scalar_lea.hbm %s220_s0, 256 }
   0x3   :  { %s19_s10 = sshll.u32 %s164_s9, 4  ;;  %p93_p0 = scmp.ne.s32.totalorder %s220_s0, %s92_s13  ;;  %s20_s10 = int_to_ptr.vmem [resolvable:$true] %s19_s10 }
   0x4   :  { %p96_p1 = scmp.lt.u32.totalorder %s92_s13, %s220_s0 }
   0x6   :  { %p98_p2 = pnand %p96_p1, %p93_p0 }
   0x8   :  { %101 = shalt.err (!%p98_p2)
}
   0x9   :  { %s102_s18 = scalar_lea.vmem %s20_s10, 256  ;;  %p107_p4 = scmp.lt.s32.totalorder %s20_s10, %s20_s10 }
   0xa   :  { %p103_p3 = scmp.ne.s32.totalorder %s20_s10, %s102_s18  ;;  %p108_p5 = scmp.lt.s32.totalorder %s102_s18, %s102_s18 }
   0xc   :  { %p109_p6 = por %p108_p5, %p107_p4 }
   0xe   :  { %p110_p7 = pnand %p109_p6, %p103_p3 }
  0x10   :  { %113 = shalt.err (!%p110_p7)
}
  0x11   :  { %s165_s19 = smov 128   ;;  %s166_s20 = smov 8  }
  0x12   :  { %25 = dma.hbm_to_vmem [thread:$0]  %s220_s0, 256, %s20_s10, [#allocation3], %s165_s19, %s165_s19, %s166_s20  }
  0x13   :  { %s167_s23 = smov [#allocation5]   ;;  %s114_s27 = scalar_lea.hbm %s221_s1, 256 }
  0x14   :  { %s35_s24 = sshll.u32 %s167_s23, 4  ;;  %p115_p8 = scmp.ne.s32.totalorder %s221_s1, %s114_s27  ;;  %s36_s24 = int_to_ptr.vmem [resolvable:$true] %s35_s24 }
  0x15   :  { %p118_p9 = scmp.lt.u32.totalorder %s114_s27, %s221_s1 }
  0x17   :  { %p120_p10 = pnand %p118_p9, %p115_p8 }
  0x19   :  { %123 = shalt.err (!%p120_p10)
}
  0x1a   :  { %s124_s4 = scalar_lea.vmem %s36_s24, 256  ;;  %p129_p12 = scmp.lt.s32.totalorder %s36_s24, %s36_s24 }
  0x1b   :  { %p125_p11 = scmp.ne.s32.totalorder %s36_s24, %s124_s4  ;;  %p130_p13 = scmp.lt.s32.totalorder %s124_s4, %s124_s4 }
  0x1d   :  { %p131_p0 = por %p130_p13, %p129_p12 }
  0x1f   :  { %p132_p1 = pnand %p131_p0, %p125_p11 }
  0x21   :  { %135 = shalt.err (!%p132_p1)
}
  0x22   :  { %41 = dma.hbm_to_vmem [thread:$0]  %s221_s1, 256, %s36_s24, [#allocation6], %s165_s19, %s165_s19, %s166_s20  }
  0x23   :  { %158 = dma.done.wait [#allocation3], 256  }
  0x24   :  { %159 = vsyncadd [#allocation3], 4294967040 }
  0x25   :  { %160 = dma.done.wait [#allocation6], 256  }
  0x26   :  { %161 = vsyncadd [#allocation6], 4294967040  ;;  %v57_v0 = vld [vmem:[#allocation2] sm:$0xff]  ;;  %v58_v1 = vld [vmem:[#allocation2 + $0x8] sm:$0xff]  ;;  %s168_s6 = smov [#allocation7]  }
  0x27   :  { %v59_v2 = vld [vmem:[#allocation5] sm:$0xff]  ;;  %v60_v3 = vld [vmem:[#allocation5 + $0x8] sm:$0xff]  ;;  %s76_s7 = sshll.u32 %s168_s6, 4  ;;  %s77_s7 = int_to_ptr.vmem [resolvable:$true] %s76_s7 }
  0x28   :  { %v61_v4 = vsub.f32 %v57_v0, %v59_v2  ;;  %v62_v5 = vsub.f32 %v58_v1, %v60_v3  ;;  %s136_s8 = scalar_lea.vmem %s77_s7, 128  ;;  %p141_p3 = scmp.lt.s32.totalorder %s77_s7, %s77_s7 }
  0x29   :  { %p137_p2 = scmp.ne.s32.totalorder %s77_s7, %s136_s8  ;;  %p142_p4 = scmp.lt.s32.totalorder %s136_s8, %s136_s8 }
  0x2a   :  { %v63_v6 = vmul.f32 %v61_v4, %v61_v4  ;;  %v64_v7 = vmul.f32 %v62_v5, %v62_v5 }
  0x2b   :  { %p143_p5 = por %p142_p4, %p141_p3 }
  0x2c   :  { %v65_v8 = vadd.f32 %v64_v7, %v63_v6 }
  0x2d   :  { %p144_p6 = pnand %p143_p5, %p137_p2 }
  0x2e   :  { %69 = vst [vmem:[#allocation7] sm:$0xff] %v65_v8 }
  0x2f   :  { %147 = shalt.err (!%p144_p6)
}
  0x30   :  { %s148_s10 = scalar_lea.hbm %s222_s2, 128 }
  0x31   :  { %p149_p7 = scmp.ne.s32.totalorder %s222_s2, %s148_s10  ;;  %p152_p8 = scmp.lt.u32.totalorder %s148_s10, %s222_s2 }
  0x33   :  { %p154_p9 = pnand %p152_p8, %p149_p7 }
  0x35   :  { %157 = shalt.err (!%p154_p9)
}
  0x36   :  { %79 = dma.vmem_to_hbm [thread:$0]  %s77_s7, 128, %s222_s2, [#allocation4]  }
  0x37   :  { %162 = dma.done.wait [#allocation4], 128  }
  0x38   :  { %163 = vsyncadd [#allocation4], 4294967168 }
  0x39   :  { %83 = vsyncpa [#allocation3], 1 }
  0x3a   :  { %84 = vsyncpa [#allocation6], 1 }
  0x3b   :  { %85 = vsyncpa [#allocation4], 1 }

</bundles_post_ra>
